<compile_context>
chip_gen: v7x
topology: tpu7x:2x2x1
jax: 0.10.0
libtpu: 0.0.40
codegen_flags: <defaults>
</compile_context>

<pallas_src>
import jax
import jax.numpy as jnp
from jax.experimental import pallas as pl
from jax.experimental.pallas import tpu as pltpu

M_TEMP = 0.5          # temperature M from ListAllLoss.__init__
EPS = 1e-09           # reference adds 1e-9 inside the log
_TARGET_BLOCK_BYTES = 4 * 1024 * 1024   # per-input block target; 2 inputs x 2 pipeline bufs ~= 16 MiB


def list_all_loss(y_pred, y_label, *, row_tile=None, core_splits=1):
    N, C = y_pred.shape
    assert y_label.shape == (N, C)

    pred_isize = jnp.dtype(y_pred.dtype).itemsize
    lbl_isize = jnp.dtype(y_label.dtype).itemsize
    isize = max(pred_isize, lbl_isize)

    # Row-tile sizing: as many rows as fit the per-input block target (amortizes the
    # ~0.35 us per-grid-step overhead), rounded to 16 so bf16 inputs stay (16,128)-legal.
    max_rows_vmem = max(16, (_TARGET_BLOCK_BYTES // (C * isize)) // 16 * 16)
    rows_needed = ((pl.cdiv(N, core_splits) + 15) // 16) * 16
    tm = min(max_rows_vmem, rows_needed)
    if row_tile is not None:
        tm = min(tm, max(16, (row_tile // 16) * 16))
    tm = max(16, tm)

    n_inner = pl.cdiv(N, core_splits * tm)
    covered = core_splits * n_inner * tm
    needs_mask = covered != N          # ragged tail handled in-kernel, no jnp.pad HBM copy

    # VMEM budget: 2 inputs x 2 pipeline buffers x (tm, C) block + tiny scalar accumulator.
    block_bytes = tm * C * (pred_isize + lbl_isize)
    vmem_limit = int(max(32 * 1024 * 1024, 2 * block_bytes + (2 << 20)))
    # TODO(synk): for vocab-scale C (where even a 16-row full-C block blows the per-TC VMEM
    # budget, esp. v7x 64 MiB physical) switch to a class-tiled online-softmax (m/s carry).

    def kernel(pred_ref, label_ref, out_ref, acc_ref):
        p_idx = pl.program_id(0)
        i = pl.program_id(1)

        @pl.when(i == 0)
        def _():
            acc_ref[...] = jnp.zeros_like(acc_ref)

        x = pred_ref[...].astype(jnp.float32) * (1.0 / M_TEMP)      # (tm, C)
        m = jnp.max(x, axis=1, keepdims=True)                       # (tm, 1)
        e = jnp.exp(x - m)
        s = jnp.sum(e, axis=1, keepdims=True)
        prob = e / s                                                 # softmax(x / M)
        logp = jnp.log(prob + EPS)                                   # exact: log(softmax + 1e-9)

        contrib = label_ref[...].astype(jnp.float32) * logp
        if needs_mask:
            # Overhanging last block reads stale/garbage rows; mask them out (masked labels may
            # multiply NaN, but the select drops it before the reduce).
            row0 = (p_idx * n_inner + i) * tm
            rows = jax.lax.broadcasted_iota(jnp.int32, (tm, C), 0) + row0
            contrib = jnp.where(rows < N, contrib, 0.0)

        # Per-tile full reduce into a tiny resident accumulator (XLU slack; frees tm*C*4 B of VMEM).
        acc_ref[...] = acc_ref[...] + jnp.sum(contrib)

        @pl.when(i == pl.num_programs(1) - 1)
        def _():
            out_ref[...] = -acc_ref[...]

    def in_map(p, i):
        return (p * n_inner + i, 0)

    out = pl.pallas_call(
        kernel,
        out_shape=jax.ShapeDtypeStruct((core_splits, 1, 1), jnp.float32),
        grid_spec=pltpu.PrefetchScalarGridSpec(
            num_scalar_prefetch=0,
            grid=(core_splits, n_inner),
            in_specs=[
                pl.BlockSpec((tm, C), in_map),
                pl.BlockSpec((tm, C), in_map),
            ],
            out_specs=pl.BlockSpec((1, 1, 1), lambda p, i: (p, 0, 0)),
            scratch_shapes=[pltpu.VMEM((1, 1, 1), jnp.float32)],
        ),
        compiler_params=pltpu.CompilerParams(
            dimension_semantics=("parallel", "arbitrary"),
            vmem_limit_bytes=vmem_limit,
        ),
    )(y_pred, y_label)
    # torch.mean(-torch.sum(...)) of the full tensor is just the negated global sum;
    # each core split wrote its own (already negated) partial.
    return jnp.sum(out)


def list_all_loss_ref(y_pred, y_label):
    # Exact PyTorch semantics: log(softmax(x / M, dim=1) + 1e-9).
    x = y_pred.astype(jnp.float32) / M_TEMP
    p = jax.nn.softmax(x, axis=1) + EPS
    return -jnp.sum(y_label.astype(jnp.float32) * jnp.log(p))


if __name__ == "__main__":
    key = jax.random.PRNGKey(0)
    k1, k2 = jax.random.split(key)
    N, C = 64, 128
    y_pred = jax.random.normal(k1, (N, C), dtype=jnp.float32)
    # soft labels (rows sum to 1), analogous to a label distribution
    raw = jax.random.uniform(k2, (N, C), dtype=jnp.float32)
    y_label = raw / jnp.sum(raw, axis=1, keepdims=True)

    loss = list_all_loss(y_pred, y_label)
    jax.block_until_ready(loss)
    ref = list_all_loss_ref(y_pred, y_label)
    assert jnp.allclose(loss, ref, rtol=1e-4, atol=1e-2), (loss, ref)

    # Ragged row count: exercises the in-kernel mask path (no jnp.pad round-trip).
    N2 = 50
    loss2 = list_all_loss(y_pred[:N2], y_label[:N2])
    jax.block_until_ready(loss2)
    ref2 = list_all_loss_ref(y_pred[:N2], y_label[:N2])
    assert jnp.allclose(loss2, ref2, rtol=1e-4, atol=1e-2), (loss2, ref2)

    print("KERNEL_OK")
</pallas_src>

<mosaic_0001>
module attributes {stable_mosaic.version = 11 : i64} {
  func.func @kernel(%arg0: i32, %arg1: i32, %arg2: memref<64x128xf32, #tpu.memory_space<vmem>>, %arg3: memref<64x128xf32, #tpu.memory_space<vmem>>, %arg4: memref<1x1x1xf32, #tpu.memory_space<vmem>>, %arg5: memref<1x1x1xf32, #tpu.memory_space<vmem>>) attributes {dimension_semantics = [#tpu.dimension_semantics<parallel>, #tpu.dimension_semantics<arbitrary>], iteration_bounds = array<i64: 1, 1>, scalar_prefetch = 0 : i64, scratch_operands = 1 : i64, tpu.core_type = #tpu.core_type<tc>, window_params = [{transform_indices = @transform_0, window_bounds = array<i64: 64, 128>}, {transform_indices = @transform_1, window_bounds = array<i64: 64, 128>}, {transform_indices = @transform_2, window_bounds = array<i64: 1, 1, 1>}]} {
    %c0_i32 = arith.constant 0 : i32
    %0 = arith.cmpi eq, %arg1, %c0_i32 : i32
    %1 = arith.extui %0 : i1 to i32
    %c0_i32_0 = arith.constant 0 : i32
    %2 = arith.cmpi ne, %1, %c0_i32_0 : i32
    scf.if %2 {
      %cst_16 = arith.constant 0.000000e+00 : f32
      %31 = vector.broadcast %cst_16 : f32 to vector<1x1x1xf32>
      %c0_17 = arith.constant 0 : index
      %c0_18 = arith.constant 0 : index
      %c0_19 = arith.constant 0 : index
      %32 = vector.load %arg5[%c0_17, %c0_18, %c0_19] : memref<1x1x1xf32, #tpu.memory_space<vmem>>, vector<1x1x1xf32>
      tpu.vector_store %arg5[%c0_17, %c0_18, %c0_19], %31 {strides = array<i32>} : memref<1x1x1xf32, #tpu.memory_space<vmem>>, vector<1x1x1xf32>,
    } else {
    }
    %c0 = arith.constant 0 : index
    %c0_1 = arith.constant 0 : index
    %3 = vector.load %arg2[%c0, %c0_1] : memref<64x128xf32, #tpu.memory_space<vmem>>, vector<64x128xf32>
    %cst = arith.constant 2.000000e+00 : f32
    %4 = vector.broadcast %cst : f32 to vector<64x128xf32>
    %5 = arith.mulf %3, %4 : vector<64x128xf32>
    %cst_2 = arith.constant dense<0xFF800000> : vector<64xf32>
    %6 = vector.multi_reduction <maximumf>, %5, %cst_2 [1] : vector<64x128xf32> to vector<64xf32>
    %7 = vector.shape_cast %6 : vector<64xf32> to vector<64x1xf32>
    %8 = vector.broadcast %7 : vector<64x1xf32> to vector<64x128xf32>
    %9 = arith.subf %5, %8 : vector<64x128xf32>
    %10 = math.exp %9 : vector<64x128xf32>
    %cst_3 = arith.constant dense<0.000000e+00> : vector<64xf32>
    %11 = vector.multi_reduction <add>, %10, %cst_3 [1] : vector<64x128xf32> to vector<64xf32>
    %12 = vector.shape_cast %11 : vector<64xf32> to vector<64x1xf32>
    %13 = vector.broadcast %12 : vector<64x1xf32> to vector<64x128xf32>
    %14 = arith.divf %10, %13 : vector<64x128xf32>
    %cst_4 = arith.constant 9.99999971E-10 : f32
    %15 = vector.broadcast %cst_4 : f32 to vector<64x128xf32>
    %16 = arith.addf %14, %15 : vector<64x128xf32>
    %17 = math.log %16 : vector<64x128xf32>
    %c0_5 = arith.constant 0 : index
    %c0_6 = arith.constant 0 : index
    %18 = vector.load %arg3[%c0_5, %c0_6] : memref<64x128xf32, #tpu.memory_space<vmem>>, vector<64x128xf32>
    %19 = arith.mulf %18, %17 : vector<64x128xf32>
    %c0_7 = arith.constant 0 : index
    %c0_8 = arith.constant 0 : index
    %c0_9 = arith.constant 0 : index
    %20 = vector.load %arg5[%c0_7, %c0_8, %c0_9] : memref<1x1x1xf32, #tpu.memory_space<vmem>>, vector<1x1x1xf32>
    %21 = vector.shape_cast %19 : vector<64x128xf32> to vector<1x64x128xf32>
    %cst_10 = arith.constant dense<0.000000e+00> : vector<1xf32>
    %22 = vector.multi_reduction <add>, %21, %cst_10 [1, 2] : vector<1x64x128xf32> to vector<1xf32>
    %23 = vector.shape_cast %22 : vector<1xf32> to vector<1x1x1xf32>
    %24 = vector.extract %23[0, 0, 0] : f32 from vector<1x1x1xf32>
    %25 = vector.broadcast %24 : f32 to vector<1x1x1xf32>
    %26 = arith.addf %20, %25 : vector<1x1x1xf32>
    %c0_11 = arith.constant 0 : index
    %c0_12 = arith.constant 0 : index
    %c0_13 = arith.constant 0 : index
    %27 = vector.load %arg5[%c0_11, %c0_12, %c0_13] : memref<1x1x1xf32, #tpu.memory_space<vmem>>, vector<1x1x1xf32>
    tpu.vector_store %arg5[%c0_11, %c0_12, %c0_13], %26 {strides = array<i32>} : memref<1x1x1xf32, #tpu.memory_space<vmem>>, vector<1x1x1xf32>,
    %c0_i32_14 = arith.constant 0 : i32
    %28 = arith.cmpi eq, %arg1, %c0_i32_14 : i32
    %29 = arith.extui %28 : i1 to i32
    %c0_i32_15 = arith.constant 0 : i32
    %30 = arith.cmpi ne, %29, %c0_i32_15 : i32
    scf.if %30 {
      %c0_16 = arith.constant 0 : index
      %c0_17 = arith.constant 0 : index
      %c0_18 = arith.constant 0 : index
      %31 = vector.load %arg5[%c0_16, %c0_17, %c0_18] : memref<1x1x1xf32, #tpu.memory_space<vmem>>, vector<1x1x1xf32>
      %cst_19 = arith.constant 0.000000e+00 : f32
      %32 = vector.broadcast %cst_19 : f32 to vector<1x1x1xf32>
      %33 = arith.subf %32, %31 : vector<1x1x1xf32>
      %c0_20 = arith.constant 0 : index
      %c0_21 = arith.constant 0 : index
      %c0_22 = arith.constant 0 : index
      %34 = vector.load %arg4[%c0_20, %c0_21, %c0_22] : memref<1x1x1xf32, #tpu.memory_space<vmem>>, vector<1x1x1xf32>
      tpu.vector_store %arg4[%c0_20, %c0_21, %c0_22], %33 {strides = array<i32>} : memref<1x1x1xf32, #tpu.memory_space<vmem>>, vector<1x1x1xf32>,
    } else {
    }
    return
  }
  func.func @transform_0(%arg0: i32, %arg1: i32) -> (i32, i32) {
    %c1_i32 = arith.constant 1 : i32
    %0 = arith.muli %arg0, %c1_i32 : i32
    %1 = arith.addi %0, %arg1 : i32
    %c0_i32 = arith.constant 0 : i32
    %c0_i32_0 = arith.constant 0 : i32
    return %1, %c0_i32 : i32, i32
  }
  func.func @transform_1(%arg0: i32, %arg1: i32) -> (i32, i32) {
    %c1_i32 = arith.constant 1 : i32
    %0 = arith.muli %arg0, %c1_i32 : i32
    %1 = arith.addi %0, %arg1 : i32
    %c0_i32 = arith.constant 0 : i32
    %c0_i32_0 = arith.constant 0 : i32
    return %1, %c0_i32 : i32, i32
  }
  func.func @transform_2(%arg0: i32, %arg1: i32) -> (i32, i32, i32) {
    %c0_i32 = arith.constant 0 : i32
    %c0_i32_0 = arith.constant 0 : i32
    %c0_i32_1 = arith.constant 0 : i32
    return %arg0, %c0_i32, %c0_i32_0 : i32, i32, i32
  }
}

</mosaic_0001>

<bundles_post_ra>
// kernel: tpu_custom_call.1
= control target key start
LH: loop header
LB: loop body
LE: loop exit
PB: predicated region body
PF: predicated region fallthrough
CT: control target
= control target key end

     0   :  { %7 = vsyncpa [#allocation4], 0  ;;  %s417_s0 = inlined_call_operand.hbm [shape: f32[64,128], index: 0, kind: input, shape index: {}]   ;;  %s418_s1 = inlined_call_operand.hbm [shape: f32[64,128], index: 1, kind: input, shape index: {}]   ;;  %s419_s2 = inlined_call_operand.hbm [shape: f32[1,1,1], index: 2, kind: output, shape index: {}]  }
   0x1   :  { %8 = vsyncpa [#allocation7], 0 }
   0x2   :  { %9 = vsyncpa [#allocation5], 0  ;;  %s357_s9 = smov [#allocation3]   ;;  %s285_s13 = scalar_lea.hbm %s417_s0, 1024 }
   0x3   :  { %s19_s10 = sshll.u32 %s357_s9, 4  ;;  %p286_p0 = scmp.ne.s32.totalorder %s417_s0, %s285_s13  ;;  %s20_s10 = int_to_ptr.vmem [resolvable:$true] %s19_s10 }
   0x4   :  { %p289_p1 = scmp.lt.u32.totalorder %s285_s13, %s417_s0 }
   0x6   :  { %p291_p2 = pnand %p289_p1, %p286_p0 }
   0x8   :  { %294 = shalt.err (!%p291_p2)
}
   0x9   :  { %s295_s18 = scalar_lea.vmem %s20_s10, 1024  ;;  %p300_p4 = scmp.lt.s32.totalorder %s20_s10, %s20_s10 }
   0xa   :  { %p296_p3 = scmp.ne.s32.totalorder %s20_s10, %s295_s18  ;;  %p301_p5 = scmp.lt.s32.totalorder %s295_s18, %s295_s18 }
   0xc   :  { %p302_p6 = por %p301_p5, %p300_p4 }
   0xe   :  { %p303_p7 = pnand %p302_p6, %p296_p3 }
  0x10   :  { %306 = shalt.err (!%p303_p7)
}
  0x11   :  { %s358_s19 = smov 128   ;;  %s359_s20 = smov 8  }
  0x12   :  { %25 = dma.hbm_to_vmem [thread:$0]  %s417_s0, 1024, %s20_s10, [#allocation4], %s358_s19, %s358_s19, %s359_s20  }
  0x13   :  { %s360_s23 = smov [#allocation6]   ;;  %s307_s27 = scalar_lea.hbm %s418_s1, 1024 }
  0x14   :  { %s35_s24 = sshll.u32 %s360_s23, 4  ;;  %p308_p8 = scmp.ne.s32.totalorder %s418_s1, %s307_s27  ;;  %s36_s24 = int_to_ptr.vmem [resolvable:$true] %s35_s24 }
  0x15   :  { %p311_p9 = scmp.lt.u32.totalorder %s307_s27, %s418_s1 }
  0x17   :  { %p313_p10 = pnand %p311_p9, %p308_p8 }
  0x19   :  { %316 = shalt.err (!%p313_p10)
}
  0x1a   :  { %s317_s4 = scalar_lea.vmem %s36_s24, 1024  ;;  %p322_p12 = scmp.lt.s32.totalorder %s36_s24, %s36_s24 }
  0x1b   :  { %p318_p11 = scmp.ne.s32.totalorder %s36_s24, %s317_s4  ;;  %p323_p13 = scmp.lt.s32.totalorder %s317_s4, %s317_s4 }
  0x1d   :  { %p324_p0 = por %p323_p13, %p322_p12 }
  0x1f   :  { %p325_p1 = pnand %p324_p0, %p318_p11 }
  0x21   :  { %328 = shalt.err (!%p325_p1)
}
  0x22   :  { %41 = dma.hbm_to_vmem [thread:$0]  %s418_s1, 1024, %s36_s24, [#allocation7], %s358_s19, %s358_s19, %s359_s20  }
  0x23   :  { %351 = dma.done.wait [#allocation4], 1024  }
  0x24   :  { %352 = vsyncadd [#allocation4], 4294966272 }
  0x25   :  { %353 = dma.done.wait [#allocation7], 1024  }
  0x26   :  { %354 = vsyncadd [#allocation7], 4294966272  ;;  %v58_v0 = vld [vmem:[#allocation3] sm:$0xff]  ;;  %v60_v1 = vld [vmem:[#allocation3 + $0x10] sm:$0xff]  ;;  %vm56_vm0 = vcmask 0   ;;  %s362_s6 = smov [#allocation8]  }
  0x27   :  { %v59_v2 = vld [vmem:[#allocation3 + $0x8] sm:$0xff]  ;;  %v66_v3 = vmul.f32 2.0, %v58_v0  ;;  %v68_v4 = vmul.f32 2.0, %v60_v1  ;;  %v61_v5 = vld [vmem:[#allocation3 + $0x18] sm:$0xff]  ;;  %v62_v8 = vld [vmem:[#allocation3 + $0x20] sm:$0xff]  ;;  %s219_s7 = sshll.u32 %s362_s6, 4  ;;  %s220_s7 = int_to_ptr.vmem [resolvable:$true] %s219_s7 }
  0x28   :  { %v67_v6 = vmul.f32 2.0, %v59_v2  ;;  %v69_v7 = vmul.f32 2.0, %v61_v5  ;;  %v63_v9 = vld [vmem:[#allocation3 + $0x28] sm:$0xff]  ;;  %v70_v10 = vmul.f32 2.0, %v62_v8  ;;  %v64_v12 = vld [vmem:[#allocation3 + $0x30] sm:$0xff]  ;;  %v65_v13 = vld [vmem:[#allocation3 + $0x38] sm:$0xff]  ;;  %p334_p3 = scmp.lt.s32.totalorder %s220_s7, %s220_s7 }
  0x29   :  { %74 = vmax.xlane.f32.xlu0 %v66_v3  ;;  %78 = vmax.xlane.f32.xlu1 %v68_v4  ;;  %v71_v11 = vmul.f32 2.0, %v63_v9  ;;  %v72_v14 = vmul.f32 2.0, %v64_v12  ;;  %v73_v15 = vmul.f32 2.0, %v65_v13  ;;  %s329_s8 = scalar_lea.vmem %s220_s7, 16  ;;  %s333_s9 = scalar_lea.vmem %s220_s7, 32 }
  0x2a   :  { %p330_p2 = scmp.ne.s32.totalorder %s220_s7, %s329_s8  ;;  %p335_p4 = scmp.lt.s32.totalorder %s333_s9, %s329_s8 }
  0x2c   :  { %p336_p5 = por %p335_p4, %p334_p3 }
  0x2d   :  { %76 = vmax.xlane.f32.xlu0 %v67_v6  ;;  %80 = vmax.xlane.f32.xlu1 %v69_v7 }
  0x2e   :  { %p337_p6 = pnand %p336_p5, %p330_p2 }
  0x31   :  { %82 = vmax.xlane.f32.xlu0 %v70_v10  ;;  %84 = vmax.xlane.f32.xlu1 %v71_v11 }
  0x35   :  { %86 = vmax.xlane.f32.xlu0 %v72_v14  ;;  %88 = vmax.xlane.f32.xlu1 %v73_v15 }
  0xb6   :  { %v75_v16 = vpop.xlane.xlu0 %74  ;;  %v79_v17 = vpop.xlane.xlu1 %78 }
  0xb7   :  { %v90_v18 = vsub.f32 %v66_v3, %v75_v16  ;;  %v92_v19 = vsub.f32 %v68_v4, %v79_v17 }
  0xb9   :  { %v98_v20 = vmul.f32 1.442695, %v90_v18  ;;  %v102_v21 = vmul.f32 1.442695, %v92_v19  ;;  %v170_v19 = vld [vmem:[#allocation6] sm:$0xff] }
  0xba   :  { %v77_v22 = vpop.xlane.xlu0 %76  ;;  %v81_v23 = vpop.xlane.xlu1 %80 }
  0xbb   :  { %237 = vpow2.f32 %v98_v20  ;;  %v91_v24 = vsub.f32 %v67_v6, %v77_v22  ;;  %v93_v25 = vsub.f32 %v69_v7, %v81_v23  ;;  %v171_v20 = vld [vmem:[#allocation6 + $0x8] sm:$0xff] }
  0xbc   :  { %239 = vpow2.f32 %v102_v21 }
  0xbd   :  { %v100_v26 = vmul.f32 1.442695, %v91_v24  ;;  %v104_v27 = vmul.f32 1.442695, %v93_v25  ;;  %v172_v24 = vld [vmem:[#allocation6 + $0x10] sm:$0xff] }
  0xbe   :  { %v83_v28 = vpop.xlane.xlu0 %82  ;;  %v85_v29 = vpop.xlane.xlu1 %84 }
  0xbf   :  { %241 = vpow2.f32 %v100_v26  ;;  %v94_v30 = vsub.f32 %v70_v10, %v83_v28  ;;  %v95_v31 = vsub.f32 %v71_v11, %v85_v29  ;;  %v173_v28 = vld [vmem:[#allocation6 + $0x18] sm:$0xff] }
  0xc0   :  { %243 = vpow2.f32 %v104_v27 }
  0xc1   :  { %v106_v32 = vmul.f32 1.442695, %v94_v30  ;;  %v108_v33 = vmul.f32 1.442695, %v95_v31 }
  0xc2   :  { %v87_v34 = vpop.xlane.xlu0 %86  ;;  %v89_v35 = vpop.xlane.xlu1 %88 }
  0xc3   :  { %245 = vpow2.f32 %v106_v32  ;;  %v96_v36 = vsub.f32 %v72_v14, %v87_v34  ;;  %v97_v37 = vsub.f32 %v73_v15, %v89_v35  ;;  %v174_v34 = vld [vmem:[#allocation6 + $0x20] sm:$0xff] }
  0xc4   :  { %247 = vpow2.f32 %v108_v33 }
  0xc5   :  { %v238_v38 = vpop.eup %237  ;;  %v110_v39 = vmul.f32 1.442695, %v96_v36  ;;  %v112_v40 = vmul.f32 1.442695, %v97_v37 }
  0xc6   :  { %114 = vadd.xlane.f32.xlu0 %v238_v38  ;;  %v240_v41 = vpop.eup %239 }
  0xc7   :  { %249 = vpow2.f32 %v110_v39 }
  0xc8   :  { %251 = vpow2.f32 %v112_v40 }
  0xc9   :  { %v242_v42 = vpop.eup %241 }
  0xca   :  { %118 = vadd.xlane.f32.xlu0 %v240_v41  ;;  %116 = vadd.xlane.f32.xlu1 %v242_v42  ;;  %v244_v43 = vpop.eup %243 }
  0xcd   :  { %v246_v44 = vpop.eup %245 }
  0xce   :  { %120 = vadd.xlane.f32.xlu1 %v244_v43  ;;  %122 = vadd.xlane.f32.xlu0 %v246_v44  ;;  %v248_v45 = vpop.eup %247 }
  0xd1   :  { %v250_v46 = vpop.eup %249 }
  0xd2   :  { %124 = vadd.xlane.f32.xlu1 %v248_v45  ;;  %126 = vadd.xlane.f32.xlu0 %v250_v46  ;;  %v252_v47 = vpop.eup %251 }
  0xd6   :  { %128 = vadd.xlane.f32.xlu1 %v252_v47 }
 0x153   :  { %v115_v48 = vpop.xlane.xlu0 %114 }
 0x154   :  { %253 = vrcp.f32 %v115_v48  ;;  %v177_v48 = vld [vmem:[#allocation6 + $0x38] sm:$0xff] }
 0x157   :  { %v117_v49 = vpop.xlane.xlu1 %116  ;;  %v119_v50 = vpop.xlane.xlu0 %118 }
 0x158   :  { %255 = vrcp.f32 %v117_v49 }
 0x159   :  { %257 = vrcp.f32 %v119_v50 }
 0x15b   :  { %v121_v51 = vpop.xlane.xlu1 %120  ;;  %v123_v52 = vpop.xlane.xlu0 %122 }
 0x15c   :  { %259 = vrcp.f32 %v121_v51 }
 0x15d   :  { %261 = vrcp.f32 %v123_v52 }
 0x15e   :  { %v254_v53 = vpop.eup %253 }
 0x15f   :  { %v131_v54 = vmul.f32 %v254_v53, %v238_v38  ;;  %v125_v55 = vpop.xlane.xlu1 %124  ;;  %v127_v56 = vpop.xlane.xlu0 %126  ;;  %v175_v38 = vld [vmem:[#allocation6 + $0x28] sm:$0xff] }
 0x160   :  { %263 = vrcp.f32 %v125_v55  ;;  %v361_v55 = vmov 0.0  }
 0x161   :  { %v146_v57 = vadd.f32 1e-09, %v131_v54  ;;  %265 = vrcp.f32 %v127_v56  ;;  %57 = vst.msk [vmem:[#allocation2] sm:$0x1] %vm56_vm0, %v361_v55 }
 0x162   :  { %v256_v58 = vpop.eup %255 }
 0x163   :  { %v258_v59 = vpop.eup %257  ;;  %267 = vlog2.f32 %v146_v57  ;;  %v133_v60 = vmul.f32 %v256_v58, %v242_v42  ;;  %v129_v61 = vpop.xlane.xlu1 %128 }
 0x164   :  { %v135_v62 = vmul.f32 %v258_v59, %v240_v41  ;;  %269 = vrcp.f32 %v129_v61 }
 0x165   :  { %v147_v63 = vadd.f32 1e-09, %v133_v60 }
 0x166   :  { %v260_v0 = vpop.eup %259  ;;  %v148_v1 = vadd.f32 1e-09, %v135_v62 }
 0x167   :  { %v262_v2 = vpop.eup %261  ;;  %271 = vlog2.f32 %v147_v63  ;;  %v137_v3 = vmul.f32 %v260_v0, %v244_v43 }
 0x168   :  { %273 = vlog2.f32 %v148_v1  ;;  %v139_v4 = vmul.f32 %v262_v2, %v246_v44  ;;  %v176_v44 = vld [vmem:[#allocation6 + $0x30] sm:$0xff]  ;;  %v186_v63 = vld [vmem:[#allocation2] sm:$0x1] }
 0x169   :  { %v149_v5 = vadd.f32 1e-09, %v137_v3 }
 0x16a   :  { %v264_v6 = vpop.eup %263  ;;  %v150_v7 = vadd.f32 1e-09, %v139_v4 }
 0x16b   :  { %v266_v8 = vpop.eup %265  ;;  %275 = vlog2.f32 %v149_v5  ;;  %v141_v9 = vmul.f32 %v264_v6, %v248_v45 }
 0x16c   :  { %277 = vlog2.f32 %v150_v7  ;;  %v143_v10 = vmul.f32 %v266_v8, %v250_v46 }
 0x16d   :  { %v268_v11 = vpop.eup %267  ;;  %v151_v12 = vadd.f32 1e-09, %v141_v9 }
 0x16e   :  { %v270_v13 = vpop.eup %269  ;;  %v152_v14 = vadd.f32 1e-09, %v143_v10  ;;  %v155_v16 = vmul.f32 0.6931472, %v268_v11 }
 0x16f   :  { %v145_v15 = vmul.f32 %v270_v13, %v252_v47  ;;  %279 = vlog2.f32 %v151_v12 }
 0x170   :  { %281 = vlog2.f32 %v152_v14  ;;  %v178_v25 = vmul.f32 %v170_v19, %v155_v16 }
 0x171   :  { %v272_v17 = vpop.eup %271  ;;  %v153_v18 = vadd.f32 1e-09, %v145_v15 }
 0x172   :  { %v274_v21 = vpop.eup %273  ;;  %v157_v22 = vmul.f32 0.6931472, %v272_v17 }
 0x173   :  { %v159_v23 = vmul.f32 0.6931472, %v274_v21  ;;  %283 = vlog2.f32 %v153_v18 }
 0x174   :  { %v179_v26 = vmul.f32 %v171_v20, %v157_v22 }
 0x175   :  { %v276_v27 = vpop.eup %275  ;;  %v180_v31 = vmul.f32 %v172_v24, %v159_v23 }
 0x176   :  { %v278_v29 = vpop.eup %277  ;;  %v161_v30 = vmul.f32 0.6931472, %v276_v27  ;;  %v187_v32 = vadd.f32 %v179_v26, %v178_v25 }
 0x177   :  { %v163_v33 = vmul.f32 0.6931472, %v278_v29 }
 0x178   :  { %v181_v35 = vmul.f32 %v173_v28, %v161_v30  ;;  %v188_v36 = vadd.f32 %v187_v32, %v180_v31 }
 0x179   :  { %v280_v37 = vpop.eup %279  ;;  %v182_v41 = vmul.f32 %v174_v34, %v163_v33 }
 0x17a   :  { %v282_v39 = vpop.eup %281  ;;  %v165_v40 = vmul.f32 0.6931472, %v280_v37  ;;  %v189_v42 = vadd.f32 %v188_v36, %v181_v35 }
 0x17b   :  { %v167_v43 = vmul.f32 0.6931472, %v282_v39 }
 0x17c   :  { %v183_v45 = vmul.f32 %v175_v38, %v165_v40  ;;  %v190_v46 = vadd.f32 %v189_v42, %v182_v41 }
 0x17d   :  { %v284_v47 = vpop.eup %283  ;;  %v184_v50 = vmul.f32 %v176_v44, %v167_v43 }
 0x17e   :  { %v169_v49 = vmul.f32 0.6931472, %v284_v47  ;;  %v191_v51 = vadd.f32 %v190_v46, %v183_v45 }
 0x180   :  { %v185_v52 = vmul.f32 %v177_v48, %v169_v49  ;;  %v192_v53 = vadd.f32 %v191_v51, %v184_v50 }
 0x182   :  { %v193_v54 = vadd.f32 %v192_v53, %v185_v52 }
 0x184   :  { %194 = vadd.xlane.f32.xlu0 %v193_v54 }
 0x211   :  { %v195_v56 = vpop.xlane.xlu0 %194 }
 0x212   :  { %v196_v57 = vrot.slane %v195_v56, 4 }
 0x214   :  { %v197_v58 = vadd.f32 %v196_v57, %v195_v56 }
 0x216   :  { %v198_v59 = vrot.slane %v197_v58, 2 }
 0x218   :  { %v199_v60 = vadd.f32 %v198_v59, %v197_v58 }
 0x21a   :  { %v200_v61 = vrot.slane %v199_v60, 1 }
 0x21c   :  { %v201_v62 = vadd.f32 %v200_v61, %v199_v60 }
 0x21e   :  { %229 = vpush %v201_v62 }
 0x24f   :  { %s230_s1 = spop %229 }
 0x250   :  { %v203_v0 = vstv %s230_s1 }
 0x251   :  { %v204_v1 = vadd.f32 %v203_v0, %v186_v63 }
 0x253   :  { %206 = vst.msk [vmem:[#allocation2] sm:$0x1] %vm56_vm0, %v204_v1 }
 0x25a   :  { %v210_v2 = vld [vmem:[#allocation2] sm:$0x1] }
 0x25b   :  { %v211_v3 = vsub.f32 0.0, %v210_v2 }
 0x25d   :  { %212 = vst.msk [vmem:[#allocation8] sm:$0x1] %vm56_vm0, %v211_v3 }
 0x25e   :  { %340 = shalt.err (!%p337_p6)
}
 0x25f   :  { %s341_s12 = scalar_lea.hbm %s419_s2, 16 }
 0x260   :  { %p342_p7 = scmp.ne.s32.totalorder %s419_s2, %s341_s12  ;;  %p345_p8 = scmp.lt.u32.totalorder %s341_s12, %s419_s2 }
 0x262   :  { %p347_p9 = pnand %p345_p8, %p342_p7 }
 0x264   :  { %350 = shalt.err (!%p347_p9)
}
 0x265   :  { %222 = dma.vmem_to_hbm [thread:$0]  %s220_s7, 16, %s419_s2, [#allocation5]  }
 0x266   :  { %355 = dma.done.wait [#allocation5], 16  }
 0x267   :  { %356 = vsyncadd [#allocation5], 4294967280 }
 0x268   :  { %226 = vsyncpa [#allocation4], 1 }
 0x269   :  { %227 = vsyncpa [#allocation7], 1 }
 0x26a   :  { %228 = vsyncpa [#allocation5], 1 }

</bundles_post_ra>
